<compile_context>
chip_gen: v5e
topology: v5e:2x2
jax: 0.10.0
libtpu: 0.0.40
codegen_flags: <defaults>
</compile_context>

<pallas_src>
import functools
import math

import jax
import jax.numpy as jnp
from jax.experimental import pallas as pl
from jax.experimental.pallas import tpu as pltpu


def _round_up(x, m):
    return ((x + m - 1) // m) * m


# ----------------------------------------------------------------------------
# Pallas kernels
# ----------------------------------------------------------------------------
def _mm_scale_act_kernel(*refs, leaky, pnorm, has_add):
    """out = (A @ W) * s ; [leaky_relu(0.2)] ; [pixel-norm over last dim] ; [+ addend]."""
    if has_add:
        a_ref, w_ref, s_ref, add_ref, o_ref = refs
    else:
        a_ref, w_ref, s_ref, o_ref = refs
    acc = jnp.dot(a_ref[...], w_ref[...], preferred_element_type=jnp.float32)
    acc = acc * s_ref[0]
    if leaky:
        acc = jnp.where(acc >= 0, acc, 0.2 * acc)
    if pnorm:
        # pn(x) = x * rsqrt(mean(x*x, channel) + 1e-8); channels are the last dim here.
        acc = acc * jax.lax.rsqrt(jnp.mean(acc * acc, axis=-1, keepdims=True) + 1e-8)
    if has_add:
        acc = acc + add_ref[...]
    o_ref[...] = acc


def matmul_scale_act(a, w, scale, *, leaky, pnorm, addend=None, tile_m=512):
    """Row-tiled (A @ W) * scale with fused activation / pixel-norm / residual add.

    Operands go to the MXU in bf16 (f32 accumulation).  The M axis is tiled so
    BlockSpec double-buffers the row tiles and the grid can be sharded across
    TensorCores ("parallel" dimension semantics).  The small (K, N) weight tile
    stays resident.
    """
    M, K = a.shape
    K2, N = w.shape
    assert K == K2
    operand_dtype = jnp.bfloat16 if K >= 8 else jnp.float32  # keep tiny-K (stem) in f32
    a = a.astype(operand_dtype)
    w = w.astype(operand_dtype)
    has_add = addend is not None

    tm = min(tile_m, _round_up(M, 8))
    m_pad = _round_up(M, tm)
    if m_pad != M:
        a = jnp.pad(a, ((0, m_pad - M), (0, 0)))
    if has_add:
        addend = addend.astype(jnp.float32)
        if m_pad != M:
            addend = jnp.pad(addend, ((0, m_pad - M), (0, 0)))

    in_specs = [
        pl.BlockSpec((tm, K), lambda i: (i, 0)),
        pl.BlockSpec((K, N), lambda i: (0, 0)),
        pl.BlockSpec(memory_space=pltpu.MemorySpace.SMEM),
    ]
    args = [a, w, jnp.reshape(jnp.asarray(scale, jnp.float32), (1,))]
    if has_add:
        in_specs.append(pl.BlockSpec((tm, N), lambda i: (i, 0)))
        args.append(addend)

    kern = functools.partial(_mm_scale_act_kernel, leaky=leaky, pnorm=pnorm,
                             has_add=has_add)
    out = pl.pallas_call(
        kern,
        grid=(m_pad // tm,),
        in_specs=in_specs,
        out_specs=pl.BlockSpec((tm, N), lambda i: (i, 0)),
        out_shape=jax.ShapeDtypeStruct((m_pad, N), jnp.float32),
        compiler_params=pltpu.CompilerParams(dimension_semantics=("parallel",)),
    )(*args)
    if m_pad != M:
        out = out[:M]
    return out


def _pool3_s1_kernel(*refs, op, leaky, H, W, has_add):
    """Stride-1 3x3 pool; padded plane read once, 9 window taps sliced in-kernel."""
    if has_add:
        x_ref, add_ref, o_ref = refs
    else:
        x_ref, o_ref = refs
    x = x_ref[...]                                   # (H+2, W+2, C)
    acc = None
    for dy in range(3):
        for dx in range(3):
            t = x[dy:dy + H, dx:dx + W, :]
            if acc is None:
                acc = t
            elif op == "avg":
                acc = acc + t
            else:
                acc = jnp.maximum(acc, t)
    if op == "avg":
        acc = acc * (1.0 / 9.0)   # count_include_pad=True semantics (PyTorch default)
    if leaky:
        acc = jnp.where(acc >= 0, acc, 0.2 * acc)
    if has_add:
        acc = acc + add_ref[...]
    o_ref[...] = acc


def _pool3_s2_kernel(*refs, op, leaky, Ho, Wo, has_add):
    """Stride-2 3x3 pool over the 4 even/odd (row, col) phases of the padded plane.

    Only the strided output positions are computed; every tap becomes a static
    slice of one phase plane, so no strided reads are needed inside the kernel.
    """
    if has_add:
        pee_ref, peo_ref, poe_ref, poo_ref, add_ref, o_ref = refs
    else:
        pee_ref, peo_ref, poe_ref, poo_ref, o_ref = refs
    phases = ((pee_ref[...], peo_ref[...]), (poe_ref[...], poo_ref[...]))
    acc = None
    for dy in range(3):
        for dx in range(3):
            p = phases[dy & 1][dx & 1]
            t = p[dy // 2:dy // 2 + Ho, dx // 2:dx // 2 + Wo, :]
            if acc is None:
                acc = t
            elif op == "avg":
                acc = acc + t
            else:
                acc = jnp.maximum(acc, t)
    if op == "avg":
        acc = acc * (1.0 / 9.0)
    if leaky:
        acc = jnp.where(acc >= 0, acc, 0.2 * acc)
    if has_add:
        acc = acc + add_ref[...]
    o_ref[...] = acc


def pool3x3(x, *, op, stride, leaky, addend=None):
    """3x3 pooling, padding=1, stride in {1,2}; x is NHWC.  Optional fused
    leaky_relu(0.2) and fused residual add (addend has the output shape)."""
    B, H, W, C = x.shape
    pad_val = 0.0 if op == "avg" else -jnp.inf
    xp = jnp.pad(x.astype(jnp.float32), ((0, 0), (1, 1), (1, 1), (0, 0)),
                 constant_values=pad_val)
    has_add = addend is not None
    if stride == 1:
        Ho, Wo = H, W
        kern = functools.partial(_pool3_s1_kernel, op=op, leaky=leaky,
                                 H=H, W=W, has_add=has_add)
        in_specs = [pl.BlockSpec((None, H + 2, W + 2, C), lambda b: (b, 0, 0, 0))]
        args = [xp]
    else:
        assert stride == 2 and H % 2 == 0 and W % 2 == 0
        Ho, Wo = H // 2, W // 2
        # even/odd phase decomposition: tap (dy, dx) of the strided 3x3 window is a
        # static slice of phase (dy&1, dx&1) at offset (dy//2, dx//2).
        args = [xp[:, dy::2, dx::2, :] for dy in range(2) for dx in range(2)]
        kern = functools.partial(_pool3_s2_kernel, op=op, leaky=leaky,
                                 Ho=Ho, Wo=Wo, has_add=has_add)
        in_specs = [pl.BlockSpec((None, Ho + 1, Wo + 1, C), lambda b: (b, 0, 0, 0))
                    for _ in range(4)]
    if has_add:
        in_specs.append(pl.BlockSpec((None, Ho, Wo, C), lambda b: (b, 0, 0, 0)))
        args.append(addend.astype(jnp.float32))
    return pl.pallas_call(
        kern,
        grid=(B,),
        in_specs=in_specs,
        out_specs=pl.BlockSpec((None, Ho, Wo, C), lambda b: (b, 0, 0, 0)),
        out_shape=jax.ShapeDtypeStruct((B, Ho, Wo, C), jnp.float32),
        compiler_params=pltpu.CompilerParams(dimension_semantics=("parallel",)),
    )(*args)


def _mbstd_kernel(x_ref, o_ref):
    x = x_ref[...]                                   # (B, H*W*C)
    mu = jnp.mean(x, axis=0, keepdims=True)
    vals = jnp.sqrt(jnp.mean((x - mu) * (x - mu), axis=0, keepdims=True) + 1e-8)
    o_ref[...] = jnp.mean(vals, keepdims=True)       # (1, 1) scalar


def minibatch_std_concat(x):
    """MinibatchStatConcatLayer: append one constant stddev channel; x is NHWC."""
    B, H, W, C = x.shape
    flat = x.reshape(B, H * W * C).astype(jnp.float32)
    val = pl.pallas_call(
        _mbstd_kernel,
        grid=(1,),
        in_specs=[pl.BlockSpec((B, H * W * C), lambda i: (0, 0))],
        out_specs=pl.BlockSpec((1, 1), lambda i: (0, 0)),
        out_shape=jax.ShapeDtypeStruct((1, 1), jnp.float32),
    )(flat)
    stat = jnp.broadcast_to(val.reshape(1, 1, 1, 1), (B, H, W, 1))
    return jnp.concatenate([x, stat], axis=-1)


# ----------------------------------------------------------------------------
# Conv glue (im2col) around the Pallas matmul kernel
# ----------------------------------------------------------------------------
def _im2col(x, kh, kw, stride, padding):
    # TODO(synk): fold the tap extraction into the matmul kernel (in-kernel loop over
    #             the kh*kw taps) to avoid materializing the kh*kw-fold patch matrix in
    #             HBM; done in bf16 here to halve that traffic in the meantime.
    B, H, W, C = x.shape
    if padding:
        x = jnp.pad(x, ((0, 0), (padding, padding), (padding, padding), (0, 0)))
    Hp, Wp = H + 2 * padding, W + 2 * padding
    Ho = (Hp - kh) // stride + 1
    Wo = (Wp - kw) // stride + 1
    cols = []
    for dy in range(kh):
        for dx in range(kw):
            cols.append(
                jax.lax.slice(
                    x,
                    (0, dy, dx, 0),
                    (B, dy + (Ho - 1) * stride + 1, dx + (Wo - 1) * stride + 1, C),
                    (1, stride, stride, 1),
                )
            )
    p = jnp.stack(cols, axis=3)                      # (B, Ho, Wo, kh*kw, C)
    return p.reshape(B * Ho * Wo, kh * kw * C), Ho, Wo


def conv2d_scaled(x, w, *, stride, padding, linear, norm_used, addend=None):
    """Mirrors Conv_regular.forward:
       scale = sqrt(mean(w**2)); y = conv(x, w/scale) * scale; [leaky_relu]; [pixel-norm];
       optionally y += addend (fused into the matmul kernel epilogue)."""
    cout, cin, kh, kw = w.shape
    B = x.shape[0]
    scale = jnp.sqrt(jnp.mean(w * w))
    w_mat = jnp.transpose(w, (2, 3, 1, 0)).reshape(kh * kw * cin, cout) / scale
    x_op = x.astype(jnp.bfloat16 if kh * kw * cin >= 8 else jnp.float32)
    if kh == 1 and kw == 1 and stride == 1 and padding == 0:
        # 1x1 conv: no patch extraction needed, just a (free) reshape.
        Ho, Wo = x.shape[1], x.shape[2]
        patches = x_op.reshape(B * Ho * Wo, cin)
    else:
        patches, Ho, Wo = _im2col(x_op, kh, kw, stride, padding)
    add2d = None if addend is None else addend.reshape(B * Ho * Wo, cout)
    # TODO(synk): batch same-kernel-size branch convs that share the same input along N
    #             so outputs are lane-dense (>=128) and fewer kernels are launched.
    out = matmul_scale_act(patches, w_mat, scale, leaky=not linear, pnorm=norm_used,
                           addend=add2d)
    return out.reshape(B, Ho, Wo, cout)


def upsample_nearest2x(x):
    return jnp.repeat(jnp.repeat(x, 2, axis=1), 2, axis=2)


# ----------------------------------------------------------------------------
# Module mirrors (deterministic parameter init)
# ----------------------------------------------------------------------------
class KeyGen:
    def __init__(self, seed):
        self._key = jax.random.PRNGKey(seed)

    def __call__(self):
        self._key, sub = jax.random.split(self._key)
        return sub


class ConvP:
    """Conv(in, out, k, padding, stride, deconv, linear, norm_used) from the reference."""

    def __init__(self, kg, in_c, out_c, k, padding=0, stride=1,
                 deconv=False, linear=False, norm_used=True):
        self.deconv = deconv
        self.stride = stride
        self.padding = padding
        self.linear = linear
        self.norm_used = norm_used
        self.w = 0.1 * jax.random.normal(kg(), (out_c, in_c, k, k), jnp.float32)

    def __call__(self, x, addend=None):
        if self.deconv:
            # TODO(synk): ConvTranspose2d path; only reached when in_ch[0] > out_ch,
            #             which never occurs inside the discriminator D.
            raise NotImplementedError("deconv path is not reachable in D")
        return conv2d_scaled(x, self.w, stride=self.stride, padding=self.padding,
                             linear=self.linear, norm_used=self.norm_used,
                             addend=addend)


class FactorizedAdjustmentP:
    def __init__(self, kg, in_ch, prev_in_ch, out_ch):
        self.in_ch, self.prev_in_ch, self.out_ch = in_ch, prev_in_ch, out_ch
        self.conv1 = ConvP(kg, in_ch, out_ch // 4, 1, padding=0)
        self.conv2 = ConvP(kg, prev_in_ch, out_ch // 4, 1, padding=0)

    def __call__(self, h):
        if self.prev_in_ch < self.in_ch:
            h[1] = pool3x3(h[1], op="avg", stride=2, leaky=False)
        elif self.prev_in_ch > self.in_ch:
            h[1] = upsample_nearest2x(h[1])
        h[0] = self.conv1(h[0])
        h[1] = self.conv2(h[1])
        return h, self.prev_in_ch * self.out_ch // 4 + self.in_ch * self.out_ch // 4


class LayerP:
    def __init__(self, kg, in_ch1, in_ch2, out_ch):
        self.in_ch = [in_ch1, in_ch2]
        self.out_ch = out_ch
        oc4 = out_ch // 4
        self.adjust = FactorizedAdjustmentP(kg, in_ch1, in_ch2, out_ch)
        self.conv3 = []
        if in_ch1 == out_ch:
            for _ in range(8):
                self.conv3.append(ConvP(kg, oc4, oc4, 3, padding=1))
        else:
            for _ in range(8):
                self.conv3.append(ConvP(kg, oc4, oc4, 2, stride=2, deconv=in_ch1 > out_ch))
        for _ in range(6):
            self.conv3.append(ConvP(kg, oc4, oc4, 3, padding=1))
        self.conv5 = []
        if in_ch1 == out_ch:
            for _ in range(8):
                self.conv5.append(ConvP(kg, oc4, oc4, 5, padding=2))
        else:
            for _ in range(8):
                self.conv5.append(ConvP(kg, oc4, oc4, 4, stride=2, padding=1,
                                        deconv=in_ch1 > out_ch))
        for _ in range(6):
            self.conv5.append(ConvP(kg, oc4, oc4, 5, padding=2))

    def __call__(self, h1, h2, code):
        in_ch, out_ch = self.in_ch, self.out_ch
        c = [[[] for _ in range(4)] for _ in range(5)]
        for i in range(4):
            tmp = [code[4 * i] % 5, code[4 * i + 1] % (i + 2),
                   code[4 * i + 2] % 5, code[4 * i + 3] % (i + 2)]
            if tmp[1] == tmp[3] and tmp[0] == tmp[2]:
                tmp[3] = (code[4 * i + 3] + 1) % (i + 2)
            c[tmp[1]][i].append(tmp[0])
            c[tmp[3]][i].append(tmp[2])
        params = 0
        scale = h1.shape[1]                       # spatial H (NHWC) == torch h1.size(2)
        if in_ch[0] > out_ch:
            scale = scale * 2
        elif in_ch[0] < out_ch:
            scale = scale // 2
        batch = h1.shape[0]
        h = [h1, h2]
        h, p = self.adjust(h)
        params += p
        # s[j] == None means "still the zeros tensor"; conv/pool of zeros is exactly
        # zeros (no bias, leaky(0)=0, pn(0)=0), so those ops can be skipped while the
        # params accounting below stays identical to the reference.
        s = [None] * 4
        for i in range(2):
            for j in range(4):
                for k in c[i][j]:
                    if k == 0 or (k == 4 and out_ch > in_ch[0]):
                        s[j] = self.conv3[4 * i + j](h[i], addend=s[j])
                        if in_ch[0] == out_ch:
                            params += out_ch * out_ch // 16
                        else:
                            params += 2 * 2 * out_ch * out_ch // 16
                    elif k == 1:
                        s[j] = self.conv5[4 * i + j](h[i], addend=s[j])
                        if in_ch[0] != out_ch:
                            params += 4 * 4 * out_ch * out_ch // 16
                        else:
                            params += 3 * 3 * out_ch * out_ch // 16
                    elif k == 2:
                        if out_ch >= in_ch[0]:
                            s[j] = pool3x3(h[i], op="avg",
                                           stride=2 if out_ch > in_ch[0] else 1,
                                           leaky=True, addend=s[j])
                        else:  # not reachable in D
                            up = upsample_nearest2x(h[i])
                            up = jnp.where(up >= 0, up, 0.2 * up)
                            s[j] = up if s[j] is None else s[j] + up
                    elif k == 3:
                        if out_ch >= in_ch[0]:
                            s[j] = pool3x3(h[i], op="max",
                                           stride=2 if out_ch > in_ch[0] else 1,
                                           leaky=True, addend=s[j])
                        else:  # not reachable in D
                            up = upsample_nearest2x(h[i])
                            up = jnp.where(up >= 0, up, 0.2 * up)
                            s[j] = up if s[j] is None else s[j] + up
                    elif k == 4:
                        if out_ch < in_ch[0]:  # not reachable in D
                            up = upsample_nearest2x(h[i])
                            s[j] = up if s[j] is None else s[j] + up
                        else:
                            s[j] = h[i] if s[j] is None else s[j] + h[i]
        pairs = [(0, 1), (0, 2), (0, 3), (1, 2), (1, 3), (2, 3)]
        for idx, (j, k) in enumerate(pairs):
            for l in c[j][k]:
                if l == 0 and s[j] is not None:
                    s[k] = self.conv3[8 + idx](s[j], addend=s[k])
                params += out_ch * out_ch // 16
                if l == 1 and s[j] is not None:
                    s[k] = self.conv5[8 + idx](s[j], addend=s[k])
                params += 3 * 3 * out_ch * out_ch // 16
                if l == 2 and s[j] is not None:
                    s[k] = pool3x3(s[j], op="avg", stride=1, leaky=True, addend=s[k])
                if l == 3 and s[j] is not None:
                    s[k] = pool3x3(s[j], op="max", stride=1, leaky=True, addend=s[k])
                if l == 4 and s[j] is not None:
                    s[k] = s[j] if s[k] is None else s[k] + s[j]
        zeros_out = jnp.zeros((batch, scale, scale, out_ch // 4), jnp.float32)
        s = [zeros_out if si is None else si for si in s]
        return jnp.concatenate(s, axis=-1), params


class BlockP:
    def __init__(self, kg, layers_per_block, in_ch, prev_in_ch):
        self.layers_per_block = layers_per_block
        self.layers = [LayerP(kg, in_ch, prev_in_ch, in_ch)]
        for _ in range(layers_per_block - 1):
            self.layers.append(LayerP(kg, in_ch, in_ch, in_ch))

    def __call__(self, h1, h2, code):
        params = 0
        for i in range(self.layers_per_block):
            x, p = self.layers[i](h1, h2, code)
            h2 = h1
            h1 = x
            params += p
        return h1, h2, params


class LinearP:
    def __init__(self, kg, in_units, out_units):
        self.w = 0.1 * jax.random.normal(kg(), (out_units, in_units), jnp.float32)
        self.b = 0.1 * jax.random.normal(kg(), (out_units,), jnp.float32)

    def __call__(self, x):
        scale = jnp.sqrt(jnp.mean(self.w * self.w))
        # PyTorch Linear.forward: (x @ (w/scale).T + b) * scale + b
        #                       == (x @ (w/scale).T)*scale + b*scale + b (bias added twice).
        y = matmul_scale_act(x, (self.w / scale).T, scale, leaky=False, pnorm=False)
        return y + self.b[None, :] * scale + self.b[None, :]


class DP:
    """Pallas re-implementation of the PyTorch discriminator `D`."""

    def __init__(self, resolution, layers_per_block=3, seed=1):
        kg = KeyGen(seed)
        self.num_blocks = int(math.log(resolution // 4, 2)) + 1
        self.layers_per_block = layers_per_block
        self.nf = lambda stage: 512 // 2 ** stage
        nf = self.nf
        self.stem_conv = ConvP(kg, 3, nf(self.num_blocks), 1, padding=0, norm_used=False)
        self.blocks = [BlockP(kg, self._precise(1), nf(self.num_blocks), nf(self.num_blocks))]
        for i in range(self.num_blocks - 1, 1, -1):
            self.blocks.append(BlockP(kg, self._precise(1), nf(i), nf(i + 1)))
        self.blocks.append(BlockP(kg, self._precise(0), nf(1), nf(2)))
        self.transes = []
        for i in range(self.num_blocks, 1, -1):
            self.transes.append(LayerP(kg, nf(i), nf(i), nf(i - 1)))
        self.end_conv = ConvP(kg, nf(1) + 1, nf(0), 4, padding=0, stride=4, norm_used=False)
        self.fc = LinearP(kg, nf(0), 1)

    def _precise(self, i):
        if i == 0:
            return self.layers_per_block - 1
        elif i == -1:
            return 1
        return self.layers_per_block

    def __call__(self, x_nchw, code):
        # layout: x_nchw is (B, 3, H, W) like PyTorch; converted to NHWC internally.
        x = jnp.transpose(x_nchw, (0, 2, 3, 1)).astype(jnp.float32)
        params = 0
        code_normal = code[0:16]
        code_trans = code[16:32]
        x = self.stem_conv(x)
        h = None
        for i in range(self.num_blocks):
            if i == 0:
                h, x, p = self.blocks[i](x, x, code_normal)
            else:
                h, x, p = self.blocks[i](h, x, code_normal)
            params += p
            if i != self.num_blocks - 1:
                tmp = h
                h, p = self.transes[i](h, x, code_trans)
                x = tmp
                params += p
        h = minibatch_std_concat(h)
        h = self.end_conv(h)
        params += 4 * 4 * self.nf(1) * self.nf(0)
        h = h.reshape(-1, h.shape[-1])   # spatial is 1x1 -> same as torch view(-1, C)
        h = self.fc(h)
        return h, params


if __name__ == "__main__":
    resolution = 8
    batch = 2
    key = jax.random.PRNGKey(0)
    x = jax.random.normal(key, (batch, 3, resolution, resolution), jnp.float32)
    # 32 code integers (each >= 1), chosen deterministically so the NAS cell exercises
    # conv3 / conv5 / avg-pool / max-pool / identity branches.
    code = [5, 2, 2, 1, 1, 3, 3, 1, 4, 4, 2, 5, 5, 2, 1, 5] * 2
    model = DP(resolution=resolution, layers_per_block=2, seed=1)
    out, params = model(x, code)
    out = jax.block_until_ready(out)
    assert out.shape == (batch, 1), out.shape
    assert bool(jnp.all(jnp.isfinite(out))), "non-finite output"
    assert params > 0
    print("KERNEL_OK")
</pallas_src>

<mosaic_0001>
module attributes {stable_mosaic.version = 11 : i64} {
  func.func @_mm_scale_act_kernel(%arg0: i32, %arg1: memref<128x3xf32, #tpu.memory_space<vmem>>, %arg2: memref<3x128xf32, #tpu.memory_space<vmem>>, %arg3: memref<1xf32, #tpu.memory_space<smem>>, %arg4: memref<128x128xf32, #tpu.memory_space<vmem>>) attributes {dimension_semantics = [#tpu.dimension_semantics<parallel>], iteration_bounds = array<i64: 1>, scalar_prefetch = 0 : i64, scratch_operands = 0 : i64, tpu.core_type = #tpu.core_type<tc>, window_params = [{transform_indices = @transform_0, window_bounds = array<i64: 128, 3>}, {pipeline_mode = #tpu.pipeline_mode<synchronous>, transform_indices = @transform_1, window_bounds = array<i64: 3, 128>}, {transform_indices = @transform_2, window_bounds = array<i64: 1>}, {transform_indices = @transform_3, window_bounds = array<i64: 128, 128>}]} {
    %c0 = arith.constant 0 : index
    %c0_0 = arith.constant 0 : index
    %0 = vector.load %arg1[%c0, %c0_0] : memref<128x3xf32, #tpu.memory_space<vmem>>, vector<128x3xf32>
    %c0_1 = arith.constant 0 : index
    %c0_2 = arith.constant 0 : index
    %1 = vector.load %arg2[%c0_1, %c0_2] : memref<3x128xf32, #tpu.memory_space<vmem>>, vector<3x128xf32>
    %cst = arith.constant dense<0.000000e+00> : vector<128x128xf32>
    %2 = tpu.matmul %0, %1, %cst {dimension_numbers = #tpu.dot_dimension_numbers<[1], [0], [0], [1], [0, 0, 1, 1], [], []>} : vector<128x3xf32>, vector<3x128xf32>, vector<128x128xf32> -> vector<128x128xf32>
    %c0_3 = arith.constant 0 : index
    %3 = memref.load %arg3[%c0_3] : memref<1xf32, #tpu.memory_space<smem>>
    %4 = vector.broadcast %3 : f32 to vector<128x128xf32>
    %5 = arith.mulf %2, %4 : vector<128x128xf32>
    %cst_4 = arith.constant 0.000000e+00 : f32
    %6 = vector.broadcast %cst_4 : f32 to vector<128x128xf32>
    %7 = arith.cmpf oge, %5, %6 : vector<128x128xf32>
    %cst_5 = arith.constant 2.000000e-01 : f32
    %8 = vector.broadcast %cst_5 : f32 to vector<128x128xf32>
    %9 = arith.mulf %8, %5 : vector<128x128xf32>
    %10 = arith.select %7, %5, %9 : vector<128x128xi1>, vector<128x128xf32>
    %c0_6 = arith.constant 0 : index
    %c0_7 = arith.constant 0 : index
    %11 = vector.load %arg4[%c0_6, %c0_7] : memref<128x128xf32, #tpu.memory_space<vmem>>, vector<128x128xf32>
    tpu.vector_store %arg4[%c0_6, %c0_7], %10 {strides = array<i32>} : memref<128x128xf32, #tpu.memory_space<vmem>>, vector<128x128xf32>,
    return
  }
  func.func @transform_0(%arg0: i32) -> (i32, i32) {
    %c0_i32 = arith.constant 0 : i32
    %c0_i32_0 = arith.constant 0 : i32
    return %arg0, %c0_i32 : i32, i32
  }
  func.func @transform_1(%arg0: i32) -> (i32, i32) {
    %c0_i32 = arith.constant 0 : i32
    %c0_i32_0 = arith.constant 0 : i32
    %c0_i32_1 = arith.constant 0 : i32
    return %c0_i32, %c0_i32_0 : i32, i32
  }
  func.func @transform_2(%arg0: i32) -> i32 {
    %c0_i32 = arith.constant 0 : i32
    %c0_i32_0 = arith.constant 0 : i32
    return %c0_i32 : i32
  }
  func.func @transform_3(%arg0: i32) -> (i32, i32) {
    %c0_i32 = arith.constant 0 : i32
    %c0_i32_0 = arith.constant 0 : i32
    return %arg0, %c0_i32 : i32, i32
  }
}

</mosaic_0001>

<bundles_post_ra>
// kernel: tpu_custom_call.1
= control target key start
LH: loop header
LB: loop body
LE: loop exit
PB: predicated region body
PF: predicated region fallthrough
CT: control target
= control target key end

     0   :  { %vm82_vm0 = vcmask 1042432   ;;  %vm33_vm1 = vcmask 23552   ;;  %s414_s0 = inlined_call_operand.vmem [shape: f32[128,3], index: 0, kind: input, shape index: {}]   ;;  %s415_s1 = inlined_call_operand.vmem [shape: f32[3,128], index: 1, kind: input, shape index: {}]   ;;  %s416_s2 = inlined_call_operand.<no memory space> [shape: f32[1], index: 2, kind: input, shape index: {}]   ;;  %s417_s3 = inlined_call_operand.hbm [shape: f32[128,128], index: 3, kind: output, shape index: {}]  }
   0x1   :  { %v32_v0 = vld [vmem:[%s415_s1] sm:$0x7] }
   0x2   :  { %v24_v1 = vld [vmem:[%s414_s0 + $0x40] sm:$0xff]  ;;  %269 = vmatpush.msk.msra.mxu2 %vm82_vm0, %v32_v0  ;;  %270 = vmatpush.msk.msra.mxu3 %vm82_vm0, %v32_v0 }
   0x3   :  { %v28_v2 = vld [vmem:[%s414_s0 + $0x60] sm:$0xff]  ;;  %260 = vmatmul.msk.f32.vlgmr.msra.gmra.mxu2 %vm33_vm1, %v24_v1  ;;  %251 = vmatpush.msk.msra.mxu0 %vm82_vm0, %v32_v0 }
   0x4   :  { %v16_v3 = vld [vmem:[%s414_s0] sm:$0xff]  ;;  %264 = vmatmul.msk.f32.vlgmr.msra.gmra.mxu3 %vm33_vm1, %v28_v2  ;;  %268 = vmatpush.msk.msra.mxu1 %vm82_vm0, %v32_v0 }
   0x5   :  { %v20_v4 = vld [vmem:[%s414_s0 + $0x20] sm:$0xff]  ;;  %252 = vmatmul.msk.f32.vlgmr.msra.gmra.mxu0 %vm33_vm1, %v16_v3 }
   0x6   :  { %256 = vmatmul.msk.f32.vlgmr.msra.gmra.mxu1 %vm33_vm1, %v20_v4 }
   0x7   :  { %9 = vsyncpa [#allocation4], 0  ;;  %v25_v5 = vld [vmem:[%s414_s0 + $0x48] sm:$0xff]  ;;  %v26_v9 = vld [vmem:[%s414_s0 + $0x50] sm:$0xff]  ;;  %v393_v17 = vstv %s416_s2  ;;  %s239_s1 = sshll.u32 %s417_s3, 4  ;;  %s301_s22 = smov 128   ;;  %s240_s1 = int_to_ptr.hbm [resolvable:$true] %s239_s1 }
   0x8   :  { %v29_v6 = vld [vmem:[%s414_s0 + $0x68] sm:$0xff]  ;;  %v30_v10 = vld [vmem:[%s414_s0 + $0x70] sm:$0xff]  ;;  %v27_v13 = vld [vmem:[%s414_s0 + $0x58] sm:$0xff]  ;;  %s302_s23 = smov 8  }
   0x9   :  { %v17_v7 = vld [vmem:[%s414_s0 + $0x8] sm:$0xff]  ;;  %v18_v11 = vld [vmem:[%s414_s0 + $0x10] sm:$0xff]  ;;  %v31_v14 = vld [vmem:[%s414_s0 + $0x78] sm:$0xff] }
   0xa   :  { %v21_v8 = vld [vmem:[%s414_s0 + $0x28] sm:$0xff]  ;;  %v22_v12 = vld [vmem:[%s414_s0 + $0x30] sm:$0xff]  ;;  %v19_v15 = vld [vmem:[%s414_s0 + $0x18] sm:$0xff] }
   0xb   :  { %261 = vmatmul.msk.f32.gmra.mxu2 %vm33_vm1, %v25_v5  ;;  %v23_v16 = vld [vmem:[%s414_s0 + $0x38] sm:$0xff]  ;;  %s300_s0 = smov [#allocation3]  }
   0xc   :  { %265 = vmatmul.msk.f32.gmra.mxu3 %vm33_vm1, %v29_v6  ;;  %s237_s2 = sshll.u32 %s300_s0, 4  ;;  %s238_s2 = int_to_ptr.vmem [resolvable:$true] %s237_s2 }
   0xd   :  { %253 = vmatmul.msk.f32.gmra.mxu0 %vm33_vm1, %v17_v7 }
   0xe   :  { %257 = vmatmul.msk.f32.gmra.mxu1 %vm33_vm1, %v21_v8 }
  0x13   :  { %262 = vmatmul.msk.f32.gmra.mxu2 %vm33_vm1, %v26_v9 }
  0x14   :  { %266 = vmatmul.msk.f32.gmra.mxu3 %vm33_vm1, %v30_v10 }
  0x15   :  { %254 = vmatmul.msk.f32.gmra.mxu0 %vm33_vm1, %v18_v11 }
  0x16   :  { %258 = vmatmul.msk.f32.gmra.mxu1 %vm33_vm1, %v22_v12 }
  0x1b   :  { %263 = vmatmul.msk.f32.gmra.mxu2 %vm33_vm1, %v27_v13 }
  0x1c   :  { %267 = vmatmul.msk.f32.gmra.mxu3 %vm33_vm1, %v31_v14 }
  0x1d   :  { %255 = vmatmul.msk.f32.gmra.mxu0 %vm33_vm1, %v19_v15 }
  0x1e   :  { %259 = vmatmul.msk.f32.gmra.mxu1 %vm33_vm1, %v23_v16 }
  0x82   :  { %v103_v18 = vpop.f32.mrf.mxu0 }
  0x83   :  { %v115_v19 = vpop.f32.mrf.mxu1  ;;  %v153_v20 = vmul.f32 %v393_v17, %v103_v18 }
  0x84   :  { %v157_v21 = vmul.f32 %v393_v17, %v115_v19 }
  0x85   :  { %vm169_vm2 = vcmp.ge.f32.partialorder %v153_v20, 0.0  ;;  %v185_v22 = vmul.f32 0.2, %v153_v20 }
  0x86   :  { %vm173_vm3 = vcmp.ge.f32.partialorder %v157_v21, 0.0  ;;  %v189_v23 = vmul.f32 0.2, %v157_v21  ;;  %v127_v24 = vpop.f32.mrf.mxu2 }
  0x87   :  { %v139_v25 = vpop.f32.mrf.mxu3  ;;  %v201_v26 = vsel %vm169_vm2, %v153_v20, %v185_v22  ;;  %v161_v28 = vmul.f32 %v393_v17, %v127_v24 }
  0x88   :  { %v205_v27 = vsel %vm173_vm3, %v157_v21, %v189_v23  ;;  %v165_v29 = vmul.f32 %v393_v17, %v139_v25  ;;  %217 = vst [vmem:[#allocation3] sm:$0xff] %v201_v26 }
  0x89   :  { %221 = vst [vmem:[#allocation3 + $0x20] sm:$0xff] %v205_v27  ;;  %vm177_vm4 = vcmp.ge.f32.partialorder %v161_v28, 0.0  ;;  %v193_v30 = vmul.f32 0.2, %v161_v28 }
  0x8a   :  { %vm181_vm5 = vcmp.ge.f32.partialorder %v165_v29, 0.0  ;;  %v197_v31 = vmul.f32 0.2, %v165_v29  ;;  %v106_v32 = vpop.f32.mrf.mxu0 }
  0x8b   :  { %v118_v33 = vpop.f32.mrf.mxu1  ;;  %v209_v34 = vsel %vm177_vm4, %v161_v28, %v193_v30  ;;  %v154_v35 = vmul.f32 %v393_v17, %v106_v32 }
  0x8c   :  { %v158_v36 = vmul.f32 %v393_v17, %v118_v33  ;;  %225 = vst [vmem:[#allocation3 + $0x40] sm:$0xff] %v209_v34  ;;  %v213_v37 = vsel %vm181_vm5, %v165_v29, %v197_v31 }
  0x8d   :  { %229 = vst [vmem:[#allocation3 + $0x60] sm:$0xff] %v213_v37  ;;  %vm170_vm6 = vcmp.ge.f32.partialorder %v154_v35, 0.0  ;;  %v186_v38 = vmul.f32 0.2, %v154_v35 }
  0x8e   :  { %vm174_vm7 = vcmp.ge.f32.partialorder %v158_v36, 0.0  ;;  %v190_v39 = vmul.f32 0.2, %v158_v36  ;;  %v130_v40 = vpop.f32.mrf.mxu2 }
  0x8f   :  { %v142_v41 = vpop.f32.mrf.mxu3  ;;  %v202_v42 = vsel %vm170_vm6, %v154_v35, %v186_v38  ;;  %v162_v43 = vmul.f32 %v393_v17, %v130_v40 }
  0x90   :  { %v166_v44 = vmul.f32 %v393_v17, %v142_v41  ;;  %218 = vst [vmem:[#allocation3 + $0x8] sm:$0xff] %v202_v42  ;;  %v206_v45 = vsel %vm174_vm7, %v158_v36, %v190_v39 }
  0x91   :  { %222 = vst [vmem:[#allocation3 + $0x28] sm:$0xff] %v206_v45  ;;  %vm178_vm8 = vcmp.ge.f32.partialorder %v162_v43, 0.0  ;;  %v194_v46 = vmul.f32 0.2, %v162_v43 }
  0x92   :  { %vm182_vm9 = vcmp.ge.f32.partialorder %v166_v44, 0.0  ;;  %v198_v47 = vmul.f32 0.2, %v166_v44  ;;  %v109_v48 = vpop.f32.mrf.mxu0 }
  0x93   :  { %v121_v49 = vpop.f32.mrf.mxu1  ;;  %v210_v50 = vsel %vm178_vm8, %v162_v43, %v194_v46  ;;  %v155_v51 = vmul.f32 %v393_v17, %v109_v48 }
  0x94   :  { %v159_v52 = vmul.f32 %v393_v17, %v121_v49  ;;  %226 = vst [vmem:[#allocation3 + $0x48] sm:$0xff] %v210_v50  ;;  %v214_v53 = vsel %vm182_vm9, %v166_v44, %v198_v47 }
  0x95   :  { %230 = vst [vmem:[#allocation3 + $0x68] sm:$0xff] %v214_v53  ;;  %vm171_vm10 = vcmp.ge.f32.partialorder %v155_v51, 0.0  ;;  %v187_v54 = vmul.f32 0.2, %v155_v51 }
  0x96   :  { %vm175_vm11 = vcmp.ge.f32.partialorder %v159_v52, 0.0  ;;  %v191_v55 = vmul.f32 0.2, %v159_v52  ;;  %v133_v56 = vpop.f32.mrf.mxu2 }
  0x97   :  { %v145_v57 = vpop.f32.mrf.mxu3  ;;  %v203_v58 = vsel %vm171_vm10, %v155_v51, %v187_v54  ;;  %v163_v59 = vmul.f32 %v393_v17, %v133_v56 }
  0x98   :  { %v167_v60 = vmul.f32 %v393_v17, %v145_v57  ;;  %219 = vst [vmem:[#allocation3 + $0x10] sm:$0xff] %v203_v58  ;;  %v207_v61 = vsel %vm175_vm11, %v159_v52, %v191_v55 }
  0x99   :  { %223 = vst [vmem:[#allocation3 + $0x30] sm:$0xff] %v207_v61  ;;  %vm179_vm12 = vcmp.ge.f32.partialorder %v163_v59, 0.0  ;;  %v195_v62 = vmul.f32 0.2, %v163_v59 }
  0x9a   :  { %vm183_vm13 = vcmp.ge.f32.partialorder %v167_v60, 0.0  ;;  %v199_v63 = vmul.f32 0.2, %v167_v60  ;;  %v112_v0 = vpop.f32.mrf.mxu0 }
  0x9b   :  { %v124_v1 = vpop.f32.mrf.mxu1  ;;  %v211_v2 = vsel %vm179_vm12, %v163_v59, %v195_v62  ;;  %v156_v3 = vmul.f32 %v393_v17, %v112_v0 }
  0x9c   :  { %v160_v4 = vmul.f32 %v393_v17, %v124_v1  ;;  %227 = vst [vmem:[#allocation3 + $0x50] sm:$0xff] %v211_v2  ;;  %v215_v5 = vsel %vm183_vm13, %v167_v60, %v199_v63 }
  0x9d   :  { %231 = vst [vmem:[#allocation3 + $0x70] sm:$0xff] %v215_v5  ;;  %vm172_vm14 = vcmp.ge.f32.partialorder %v156_v3, 0.0  ;;  %v188_v6 = vmul.f32 0.2, %v156_v3 }
  0x9e   :  { %vm176_vm15 = vcmp.ge.f32.partialorder %v160_v4, 0.0  ;;  %v192_v7 = vmul.f32 0.2, %v160_v4  ;;  %v136_v8 = vpop.f32.mrf.mxu2 }
  0x9f   :  { %v148_v9 = vpop.f32.mrf.mxu3  ;;  %v204_v10 = vsel %vm172_vm14, %v156_v3, %v188_v6  ;;  %v164_v11 = vmul.f32 %v393_v17, %v136_v8 }
  0xa0   :  { %v168_v12 = vmul.f32 %v393_v17, %v148_v9  ;;  %220 = vst [vmem:[#allocation3 + $0x18] sm:$0xff] %v204_v10  ;;  %v208_v13 = vsel %vm176_vm15, %v160_v4, %v192_v7 }
  0xa1   :  { %224 = vst [vmem:[#allocation3 + $0x38] sm:$0xff] %v208_v13  ;;  %vm180_vm0 = vcmp.ge.f32.partialorder %v164_v11, 0.0  ;;  %v196_v14 = vmul.f32 0.2, %v164_v11 }
  0xa2   :  { %vm184_vm1 = vcmp.ge.f32.partialorder %v168_v12, 0.0  ;;  %v200_v15 = vmul.f32 0.2, %v168_v12 }
  0xa3   :  { %v212_v16 = vsel %vm180_vm0, %v164_v11, %v196_v14 }
  0xa4   :  { %228 = vst [vmem:[#allocation3 + $0x58] sm:$0xff] %v212_v16  ;;  %v216_v18 = vsel %vm184_vm1, %v168_v12, %v200_v15 }
  0xa5   :  { %232 = vst [vmem:[#allocation3 + $0x78] sm:$0xff] %v216_v18 }
  0xa6   :  { %245 = dma.vmem_to_hbm [thread:$0]  %s238_s2, 2048, %s240_s1, [#allocation4], %s301_s22, %s301_s22, %s302_s23  }
  0xa7   :  { %298 = dma.done.wait [#allocation4], 2048  }
  0xa8   :  { %299 = vsyncadd [#allocation4], 4294965248 }
  0xa9   :  { %250 = vsyncpa [#allocation4], 1 }

</bundles_post_ra>
